<compile_context>
chip_gen: v6e
topology: v6e:2x2x1
jax: 0.10.0
libtpu: 0.0.40
codegen_flags: <defaults>
</compile_context>

<pallas_src>
import math
import functools

import jax
import jax.numpy as jnp
from jax import lax
from jax.experimental import pallas as pl
from jax.experimental.pallas import tpu as pltpu


# ----------------------------- kernel 1: fused QKV projection -----------------------------

def qkv_proj_kernel(x_ref, wqkv_ref, bqkv_ref, q_ref, k_ref, v_ref,
                    *, num_heads, head_dim):
    """x tile (TS,H) -> q/k/v head-major bf16 tiles (nh, TS, hd)."""
    H = num_heads * head_dim
    x_bf = x_ref[...].astype(jnp.bfloat16)                         # (TS, H)
    qkv = jnp.dot(x_bf, wqkv_ref[...],
                  preferred_element_type=jnp.float32)              # (TS, 3H), f32 acc
    qkv = (qkv + bqkv_ref[...]).astype(jnp.bfloat16)               # bias once, cast once
    # Head-split relayout (one-time O(S*3H) shuffle, overlapped with the GEMM
    # pipeline).  Static slices + leading-axis stores; keeps the attention
    # kernel's accesses full-slab / head-major.
    for h in range(num_heads):
        lo = h * head_dim
        q_ref[h] = qkv[:, lo:lo + head_dim]
        k_ref[h] = qkv[:, H + lo:H + lo + head_dim]
        v_ref[h] = qkv[:, 2 * H + lo:2 * H + lo + head_dim]


# ----------------------------- kernel 2: attention + output + LayerNorm -------------------

def bert_attention_kernel(x_ref, q_ref, k_ref, v_ref, wo_ref, bo_ref,
                          gamma_ref, beta_ref, out_ref, *, eps):
    q = q_ref[...]                                                 # (nh, TQ, hd) bf16, pre-scaled
    k = k_ref[...]                                                 # (nh, S,  hd) bf16
    v = v_ref[...]                                                 # (nh, S,  hd) bf16

    # scores for all heads at once (batched MXU matmul, f32 accumulation)
    s = jnp.einsum('hqd,hkd->hqk', q, k,
                   preferred_element_type=jnp.float32)             # (nh, TQ, S)
    s = s - jnp.max(s, axis=-1, keepdims=True)
    p = jnp.exp(s)
    denom = jnp.sum(p, axis=-1, keepdims=True)                     # (nh, TQ, 1)

    # unnormalized context, then deferred normalization on the (nh,TQ,hd) result
    ctx = jnp.einsum('hqk,hkd->hqd', p.astype(jnp.bfloat16), v,
                     preferred_element_type=jnp.float32)           # (nh, TQ, hd)
    ctx = (ctx * pl.reciprocal(denom, approx=True)).astype(jnp.bfloat16)

    # head-merge folded into the output projection: per-head GEMM against the
    # matching (hd, H) slab of Wo, reduced over heads (no transpose/reshape).
    o_h = jnp.einsum('hqd,hdo->hqo', ctx, wo_ref[...],
                     preferred_element_type=jnp.float32)           # (nh, TQ, H)
    o = jnp.sum(o_h, axis=0) + bo_ref[...]                         # (TQ, H)

    # residual add + TF-style LayerNorm (eps inside the sqrt)
    y = o + x_ref[...].astype(jnp.float32)
    u = jnp.mean(y, axis=-1, keepdims=True)
    var = jnp.mean((y - u) ** 2, axis=-1, keepdims=True)
    yn = (y - u) * lax.rsqrt(var + eps)
    out_ref[...] = (gamma_ref[...] * yn + beta_ref[...]).astype(out_ref.dtype)


# ----------------------------- tiling helpers ----------------------------------------------

def _pick_q_block(S, num_heads, H):
    """Largest query tile whose f32 in-kernel temps (scores + per-head out-proj)
    stay well inside the default scoped VMEM limit."""
    best = S
    for cand in (512, 256, 128):
        if S % cand == 0 and S > cand:
            best = cand
            temp_bytes = 4 * num_heads * cand * (S + H)   # (nh,TQ,S) + (nh,TQ,H) f32
            if temp_bytes <= 12 * 1024 * 1024:
                return cand
    return best


def _pick_row_block(S):
    for cand in (256, 128):
        if S % cand == 0 and S > cand:
            return cand
    return S


# ----------------------------- wrapper -----------------------------------------------------

def prepare_params(params, *, num_heads):
    """One-time parameter preparation (hoisted out of the forward call):
    fused bf16 Wqkv with 1/sqrt(hd) folded into the Q slice, head-major Wo."""
    (wq, bq, wk, bk, wv, bv, wo, bo, gamma, beta) = params
    H = wq.shape[0]
    hd = H // num_heads
    scale = 1.0 / math.sqrt(hd)
    wqkv = jnp.concatenate([wq * scale, wk, wv], axis=1).astype(jnp.bfloat16)   # (H, 3H)
    bqkv = jnp.concatenate([bq * scale, bk, bv], axis=1).astype(jnp.float32)    # (1, 3H)
    wo_heads = wo.reshape(num_heads, hd, H).astype(jnp.bfloat16)                # (nh, hd, H)
    return (wqkv, bqkv, wo_heads,
            bo.astype(jnp.float32), gamma.astype(jnp.float32), beta.astype(jnp.float32))


def bert_attention(x, prepared, *, num_heads):
    B, S, H = x.shape
    hd = H // num_heads
    wqkv, bqkv, wo_heads, bo, gamma, beta = prepared

    # ---- pallas_call 1: fused QKV projection -> head-major bf16 q/k/v ----
    ts = _pick_row_block(S)
    qkv_kernel = functools.partial(qkv_proj_kernel, num_heads=num_heads, head_dim=hd)
    q, k, v = pl.pallas_call(
        qkv_kernel,
        out_shape=(jax.ShapeDtypeStruct((B, num_heads, S, hd), jnp.bfloat16),
                   jax.ShapeDtypeStruct((B, num_heads, S, hd), jnp.bfloat16),
                   jax.ShapeDtypeStruct((B, num_heads, S, hd), jnp.bfloat16)),
        grid_spec=pltpu.PrefetchScalarGridSpec(
            num_scalar_prefetch=0,
            grid=(B, S // ts),
            in_specs=[
                pl.BlockSpec((None, ts, H), lambda b, si: (b, si, 0)),     # x row tile
                pl.BlockSpec((H, 3 * H), lambda b, si: (0, 0)),            # Wqkv (bf16)
                pl.BlockSpec((1, 3 * H), lambda b, si: (0, 0)),            # bqkv (f32)
            ],
            out_specs=[
                pl.BlockSpec((None, num_heads, ts, hd), lambda b, si: (b, 0, si, 0)),
                pl.BlockSpec((None, num_heads, ts, hd), lambda b, si: (b, 0, si, 0)),
                pl.BlockSpec((None, num_heads, ts, hd), lambda b, si: (b, 0, si, 0)),
            ],
        ),
        compiler_params=pltpu.CompilerParams(
            dimension_semantics=("parallel", "parallel")),
        cost_estimate=pl.CostEstimate(
            flops=6 * B * S * H * H,
            transcendentals=0,
            bytes_accessed=B * S * H * 4 + 3 * B * S * H * 2 + 3 * H * H * 2),
    )(x, wqkv, bqkv)

    # ---- pallas_call 2: per-query-tile attention + output proj + residual + LayerNorm ----
    tq = _pick_q_block(S, num_heads, H)
    attn_kernel = functools.partial(bert_attention_kernel, eps=1e-12)
    # NOTE: K/V block indices are constant across the query-tile axis, so they are
    # fetched once per batch element and the next batch element's K/V prefetches
    # behind the last query tiles of the current one.  If targeting v5e's 16 MiB
    # default scoped VMEM at large H, pass an explicit vmem_limit_bytes here.
    return pl.pallas_call(
        attn_kernel,
        out_shape=jax.ShapeDtypeStruct((B, S, H), x.dtype),
        grid_spec=pltpu.PrefetchScalarGridSpec(
            num_scalar_prefetch=0,
            grid=(B, S // tq),
            in_specs=[
                pl.BlockSpec((None, tq, H), lambda b, qi: (b, qi, 0)),                    # residual x
                pl.BlockSpec((None, num_heads, tq, hd), lambda b, qi: (b, 0, qi, 0)),     # Q tile
                pl.BlockSpec((None, num_heads, S, hd), lambda b, qi: (b, 0, 0, 0)),       # K (per batch)
                pl.BlockSpec((None, num_heads, S, hd), lambda b, qi: (b, 0, 0, 0)),       # V (per batch)
                pl.BlockSpec((num_heads, hd, H), lambda b, qi: (0, 0, 0)),                # Wo head-major
                pl.BlockSpec((1, H), lambda b, qi: (0, 0)),                               # bo
                pl.BlockSpec((1, H), lambda b, qi: (0, 0)),                               # gamma
                pl.BlockSpec((1, H), lambda b, qi: (0, 0)),                               # beta
            ],
            out_specs=pl.BlockSpec((None, tq, H), lambda b, qi: (b, qi, 0)),
        ),
        compiler_params=pltpu.CompilerParams(
            dimension_semantics=("parallel", "parallel")),
        cost_estimate=pl.CostEstimate(
            flops=B * (4 * S * S * H + 2 * S * H * H),
            transcendentals=B * num_heads * S * S,
            bytes_accessed=(3 * B * S * H * 2      # q (per tile) + k/v (once per batch), bf16
                            + 2 * B * S * H * 4    # residual read + output write, f32
                            + H * H * 2            # Wo bf16
                            + 4 * H * 4)),
    )(x, q, k, v, wo_heads, bo, gamma, beta)


# ----------------------------- params & pure-JAX reference ---------------------------------

def init_params(key, hidden_size):
    """Deterministic parameter init. Linear weights stored as (in, out) = W_pt.T."""
    keys = jax.random.split(key, 8)
    std = 0.02

    def lin(kw, kb):
        w = jax.random.normal(kw, (hidden_size, hidden_size), jnp.float32) * std
        b = jax.random.normal(kb, (1, hidden_size), jnp.float32) * std
        return w, b

    wq, bq = lin(keys[0], keys[1])
    wk, bk = lin(keys[2], keys[3])
    wv, bv = lin(keys[4], keys[5])
    wo, bo = lin(keys[6], keys[7])
    gamma = jnp.ones((1, hidden_size), jnp.float32)
    beta = jnp.zeros((1, hidden_size), jnp.float32)
    return (wq, bq, wk, bk, wv, bv, wo, bo, gamma, beta)


def bert_attention_ref(x, params, *, num_heads):
    """Pure-JAX f32 reference mirroring the PyTorch forward (dropout = identity)."""
    (wq, bq, wk, bk, wv, bv, wo, bo, gamma, beta) = params
    B, S, H = x.shape
    hd = H // num_heads
    q = x @ wq + bq
    k = x @ wk + bk
    v = x @ wv + bv

    def split(t):  # (B,S,H) -> (B, nh, S, hd)
        return t.reshape(B, S, num_heads, hd).transpose(0, 2, 1, 3)

    qh, kh, vh = split(q), split(k), split(v)
    scores = jnp.einsum('bhqd,bhkd->bhqk', qh, kh) / math.sqrt(hd)
    probs = jax.nn.softmax(scores, axis=-1)
    ctx = jnp.einsum('bhqk,bhkd->bhqd', probs, vh)
    ctx = ctx.transpose(0, 2, 1, 3).reshape(B, S, H)
    o = ctx @ wo + bo
    y = o + x
    u = y.mean(-1, keepdims=True)
    var = ((y - u) ** 2).mean(-1, keepdims=True)
    yn = (y - u) / jnp.sqrt(var + 1e-12)
    return gamma * yn + beta


if __name__ == "__main__":
    B, S, H, NH = 2, 8, 32, 4
    key = jax.random.PRNGKey(0)
    kx, kp = jax.random.split(key)
    x = jax.random.normal(kx, (B, S, H), jnp.float32)
    params = init_params(kp, H)

    prepared = prepare_params(params, num_heads=NH)   # one-time param prep
    out = bert_attention(x, prepared, num_heads=NH)
    out = jax.block_until_ready(out)

    ref = bert_attention_ref(x, params, num_heads=NH)
    assert out.shape == (B, S, H)
    # bf16 MXU operands (f32 accumulation) + approx reciprocal => relaxed tolerance
    # vs. the pure-f32 reference.
    assert jnp.allclose(out, ref, atol=2e-2, rtol=2e-2), "mismatch vs reference"

    print("KERNEL_OK")
</pallas_src>

<mosaic_0001>
module attributes {stable_mosaic.version = 11 : i64} {
  func.func @qkv_proj_kernel(%arg0: i32, %arg1: i32, %arg2: memref<1x8x32xf32, #tpu.memory_space<vmem>>, %arg3: memref<32x96xbf16, #tpu.memory_space<vmem>>, %arg4: memref<1x96xf32, #tpu.memory_space<vmem>>, %arg5: memref<1x4x8x8xbf16, #tpu.memory_space<vmem>>, %arg6: memref<1x4x8x8xbf16, #tpu.memory_space<vmem>>, %arg7: memref<1x4x8x8xbf16, #tpu.memory_space<vmem>>) attributes {dimension_semantics = [#tpu.dimension_semantics<parallel>, #tpu.dimension_semantics<parallel>], iteration_bounds = array<i64: 2, 1>, scalar_prefetch = 0 : i64, scratch_operands = 0 : i64, tpu.core_type = #tpu.core_type<tc>, window_params = [{transform_indices = @transform_0, window_bounds = array<i64: 1, 8, 32>}, {pipeline_mode = #tpu.pipeline_mode<synchronous>, transform_indices = @transform_1, window_bounds = array<i64: 32, 96>}, {pipeline_mode = #tpu.pipeline_mode<synchronous>, transform_indices = @transform_2, window_bounds = array<i64: 1, 96>}, {transform_indices = @transform_3, window_bounds = array<i64: 1, 4, 8, 8>}, {transform_indices = @transform_4, window_bounds = array<i64: 1, 4, 8, 8>}, {transform_indices = @transform_5, window_bounds = array<i64: 1, 4, 8, 8>}]} {
    %c0 = arith.constant 0 : index
    %c0_0 = arith.constant 0 : index
    %c0_1 = arith.constant 0 : index
    %0 = vector.load %arg2[%c0, %c0_0, %c0_1] : memref<1x8x32xf32, #tpu.memory_space<vmem>>, vector<1x8x32xf32>
    %1 = vector.shape_cast %0 : vector<1x8x32xf32> to vector<8x32xf32>
    %2 = arith.truncf %1 : vector<8x32xf32> to vector<8x32xbf16>
    %c0_2 = arith.constant 0 : index
    %c0_3 = arith.constant 0 : index
    %3 = vector.load %arg3[%c0_2, %c0_3] : memref<32x96xbf16, #tpu.memory_space<vmem>>, vector<32x96xbf16>
    %cst = arith.constant dense<0.000000e+00> : vector<8x96xf32>
    %4 = tpu.matmul %2, %3, %cst {dimension_numbers = #tpu.dot_dimension_numbers<[1], [0], [0], [1], [0, 0, 1, 1], [], []>} : vector<8x32xbf16>, vector<32x96xbf16>, vector<8x96xf32> -> vector<8x96xf32>
    %c0_4 = arith.constant 0 : index
    %c0_5 = arith.constant 0 : index
    %5 = vector.load %arg4[%c0_4, %c0_5] : memref<1x96xf32, #tpu.memory_space<vmem>>, vector<1x96xf32>
    %6 = vector.broadcast %5 : vector<1x96xf32> to vector<8x96xf32>
    %7 = arith.addf %4, %6 : vector<8x96xf32>
    %8 = arith.truncf %7 : vector<8x96xf32> to vector<8x96xbf16>
    %9 = vector.extract_strided_slice %8 {offsets = [0, 0], sizes = [8, 8], strides = [1, 1]} : vector<8x96xbf16> to vector<8x8xbf16>
    %c0_6 = arith.constant 0 : index
    %c0_7 = arith.constant 0 : index
    %c0_8 = arith.constant 0 : index
    %c0_9 = arith.constant 0 : index
    %10 = vector.load %arg5[%c0_6, %c0_7, %c0_8, %c0_9] : memref<1x4x8x8xbf16, #tpu.memory_space<vmem>>, vector<1x1x8x8xbf16>
    %11 = vector.shape_cast %10 : vector<1x1x8x8xbf16> to vector<8x8xbf16>
    %12 = vector.shape_cast %9 : vector<8x8xbf16> to vector<1x1x8x8xbf16>
    tpu.vector_store %arg5[%c0_6, %c0_7, %c0_8, %c0_9], %12 {strides = array<i32>} : memref<1x4x8x8xbf16, #tpu.memory_space<vmem>>, vector<1x1x8x8xbf16>,
    %13 = vector.extract_strided_slice %8 {offsets = [0, 32], sizes = [8, 8], strides = [1, 1]} : vector<8x96xbf16> to vector<8x8xbf16>
    %c0_10 = arith.constant 0 : index
    %c0_11 = arith.constant 0 : index
    %c0_12 = arith.constant 0 : index
    %c0_13 = arith.constant 0 : index
    %14 = vector.load %arg6[%c0_10, %c0_11, %c0_12, %c0_13] : memref<1x4x8x8xbf16, #tpu.memory_space<vmem>>, vector<1x1x8x8xbf16>
    %15 = vector.shape_cast %14 : vector<1x1x8x8xbf16> to vector<8x8xbf16>
    %16 = vector.shape_cast %13 : vector<8x8xbf16> to vector<1x1x8x8xbf16>
    tpu.vector_store %arg6[%c0_10, %c0_11, %c0_12, %c0_13], %16 {strides = array<i32>} : memref<1x4x8x8xbf16, #tpu.memory_space<vmem>>, vector<1x1x8x8xbf16>,
    %17 = vector.extract_strided_slice %8 {offsets = [0, 64], sizes = [8, 8], strides = [1, 1]} : vector<8x96xbf16> to vector<8x8xbf16>
    %c0_14 = arith.constant 0 : index
    %c0_15 = arith.constant 0 : index
    %c0_16 = arith.constant 0 : index
    %c0_17 = arith.constant 0 : index
    %18 = vector.load %arg7[%c0_14, %c0_15, %c0_16, %c0_17] : memref<1x4x8x8xbf16, #tpu.memory_space<vmem>>, vector<1x1x8x8xbf16>
    %19 = vector.shape_cast %18 : vector<1x1x8x8xbf16> to vector<8x8xbf16>
    %20 = vector.shape_cast %17 : vector<8x8xbf16> to vector<1x1x8x8xbf16>
    tpu.vector_store %arg7[%c0_14, %c0_15, %c0_16, %c0_17], %20 {strides = array<i32>} : memref<1x4x8x8xbf16, #tpu.memory_space<vmem>>, vector<1x1x8x8xbf16>,
    %21 = vector.extract_strided_slice %8 {offsets = [0, 8], sizes = [8, 8], strides = [1, 1]} : vector<8x96xbf16> to vector<8x8xbf16>
    %c0_18 = arith.constant 0 : index
    %c1 = arith.constant 1 : index
    %c0_19 = arith.constant 0 : index
    %c0_20 = arith.constant 0 : index
    %22 = vector.load %arg5[%c0_18, %c1, %c0_19, %c0_20] : memref<1x4x8x8xbf16, #tpu.memory_space<vmem>>, vector<1x1x8x8xbf16>
    %23 = vector.shape_cast %22 : vector<1x1x8x8xbf16> to vector<8x8xbf16>
    %24 = vector.shape_cast %21 : vector<8x8xbf16> to vector<1x1x8x8xbf16>
    tpu.vector_store %arg5[%c0_18, %c1, %c0_19, %c0_20], %24 {strides = array<i32>} : memref<1x4x8x8xbf16, #tpu.memory_space<vmem>>, vector<1x1x8x8xbf16>,
    %25 = vector.extract_strided_slice %8 {offsets = [0, 40], sizes = [8, 8], strides = [1, 1]} : vector<8x96xbf16> to vector<8x8xbf16>
    %c0_21 = arith.constant 0 : index
    %c1_22 = arith.constant 1 : index
    %c0_23 = arith.constant 0 : index
    %c0_24 = arith.constant 0 : index
    %26 = vector.load %arg6[%c0_21, %c1_22, %c0_23, %c0_24] : memref<1x4x8x8xbf16, #tpu.memory_space<vmem>>, vector<1x1x8x8xbf16>
    %27 = vector.shape_cast %26 : vector<1x1x8x8xbf16> to vector<8x8xbf16>
    %28 = vector.shape_cast %25 : vector<8x8xbf16> to vector<1x1x8x8xbf16>
    tpu.vector_store %arg6[%c0_21, %c1_22, %c0_23, %c0_24], %28 {strides = array<i32>} : memref<1x4x8x8xbf16, #tpu.memory_space<vmem>>, vector<1x1x8x8xbf16>,
    %29 = vector.extract_strided_slice %8 {offsets = [0, 72], sizes = [8, 8], strides = [1, 1]} : vector<8x96xbf16> to vector<8x8xbf16>
    %c0_25 = arith.constant 0 : index
    %c1_26 = arith.constant 1 : index
    %c0_27 = arith.constant 0 : index
    %c0_28 = arith.constant 0 : index
    %30 = vector.load %arg7[%c0_25, %c1_26, %c0_27, %c0_28] : memref<1x4x8x8xbf16, #tpu.memory_space<vmem>>, vector<1x1x8x8xbf16>
    %31 = vector.shape_cast %30 : vector<1x1x8x8xbf16> to vector<8x8xbf16>
    %32 = vector.shape_cast %29 : vector<8x8xbf16> to vector<1x1x8x8xbf16>
    tpu.vector_store %arg7[%c0_25, %c1_26, %c0_27, %c0_28], %32 {strides = array<i32>} : memref<1x4x8x8xbf16, #tpu.memory_space<vmem>>, vector<1x1x8x8xbf16>,
    %33 = vector.extract_strided_slice %8 {offsets = [0, 16], sizes = [8, 8], strides = [1, 1]} : vector<8x96xbf16> to vector<8x8xbf16>
    %c0_29 = arith.constant 0 : index
    %c2 = arith.constant 2 : index
    %c0_30 = arith.constant 0 : index
    %c0_31 = arith.constant 0 : index
    %34 = vector.load %arg5[%c0_29, %c2, %c0_30, %c0_31] : memref<1x4x8x8xbf16, #tpu.memory_space<vmem>>, vector<1x1x8x8xbf16>
    %35 = vector.shape_cast %34 : vector<1x1x8x8xbf16> to vector<8x8xbf16>
    %36 = vector.shape_cast %33 : vector<8x8xbf16> to vector<1x1x8x8xbf16>
    tpu.vector_store %arg5[%c0_29, %c2, %c0_30, %c0_31], %36 {strides = array<i32>} : memref<1x4x8x8xbf16, #tpu.memory_space<vmem>>, vector<1x1x8x8xbf16>,
    %37 = vector.extract_strided_slice %8 {offsets = [0, 48], sizes = [8, 8], strides = [1, 1]} : vector<8x96xbf16> to vector<8x8xbf16>
    %c0_32 = arith.constant 0 : index
    %c2_33 = arith.constant 2 : index
    %c0_34 = arith.constant 0 : index
    %c0_35 = arith.constant 0 : index
    %38 = vector.load %arg6[%c0_32, %c2_33, %c0_34, %c0_35] : memref<1x4x8x8xbf16, #tpu.memory_space<vmem>>, vector<1x1x8x8xbf16>
    %39 = vector.shape_cast %38 : vector<1x1x8x8xbf16> to vector<8x8xbf16>
    %40 = vector.shape_cast %37 : vector<8x8xbf16> to vector<1x1x8x8xbf16>
    tpu.vector_store %arg6[%c0_32, %c2_33, %c0_34, %c0_35], %40 {strides = array<i32>} : memref<1x4x8x8xbf16, #tpu.memory_space<vmem>>, vector<1x1x8x8xbf16>,
    %41 = vector.extract_strided_slice %8 {offsets = [0, 80], sizes = [8, 8], strides = [1, 1]} : vector<8x96xbf16> to vector<8x8xbf16>
    %c0_36 = arith.constant 0 : index
    %c2_37 = arith.constant 2 : index
    %c0_38 = arith.constant 0 : index
    %c0_39 = arith.constant 0 : index
    %42 = vector.load %arg7[%c0_36, %c2_37, %c0_38, %c0_39] : memref<1x4x8x8xbf16, #tpu.memory_space<vmem>>, vector<1x1x8x8xbf16>
    %43 = vector.shape_cast %42 : vector<1x1x8x8xbf16> to vector<8x8xbf16>
    %44 = vector.shape_cast %41 : vector<8x8xbf16> to vector<1x1x8x8xbf16>
    tpu.vector_store %arg7[%c0_36, %c2_37, %c0_38, %c0_39], %44 {strides = array<i32>} : memref<1x4x8x8xbf16, #tpu.memory_space<vmem>>, vector<1x1x8x8xbf16>,
    %45 = vector.extract_strided_slice %8 {offsets = [0, 24], sizes = [8, 8], strides = [1, 1]} : vector<8x96xbf16> to vector<8x8xbf16>
    %c0_40 = arith.constant 0 : index
    %c3 = arith.constant 3 : index
    %c0_41 = arith.constant 0 : index
    %c0_42 = arith.constant 0 : index
    %46 = vector.load %arg5[%c0_40, %c3, %c0_41, %c0_42] : memref<1x4x8x8xbf16, #tpu.memory_space<vmem>>, vector<1x1x8x8xbf16>
    %47 = vector.shape_cast %46 : vector<1x1x8x8xbf16> to vector<8x8xbf16>
    %48 = vector.shape_cast %45 : vector<8x8xbf16> to vector<1x1x8x8xbf16>
    tpu.vector_store %arg5[%c0_40, %c3, %c0_41, %c0_42], %48 {strides = array<i32>} : memref<1x4x8x8xbf16, #tpu.memory_space<vmem>>, vector<1x1x8x8xbf16>,
    %49 = vector.extract_strided_slice %8 {offsets = [0, 56], sizes = [8, 8], strides = [1, 1]} : vector<8x96xbf16> to vector<8x8xbf16>
    %c0_43 = arith.constant 0 : index
    %c3_44 = arith.constant 3 : index
    %c0_45 = arith.constant 0 : index
    %c0_46 = arith.constant 0 : index
    %50 = vector.load %arg6[%c0_43, %c3_44, %c0_45, %c0_46] : memref<1x4x8x8xbf16, #tpu.memory_space<vmem>>, vector<1x1x8x8xbf16>
    %51 = vector.shape_cast %50 : vector<1x1x8x8xbf16> to vector<8x8xbf16>
    %52 = vector.shape_cast %49 : vector<8x8xbf16> to vector<1x1x8x8xbf16>
    tpu.vector_store %arg6[%c0_43, %c3_44, %c0_45, %c0_46], %52 {strides = array<i32>} : memref<1x4x8x8xbf16, #tpu.memory_space<vmem>>, vector<1x1x8x8xbf16>,
    %53 = vector.extract_strided_slice %8 {offsets = [0, 88], sizes = [8, 8], strides = [1, 1]} : vector<8x96xbf16> to vector<8x8xbf16>
    %c0_47 = arith.constant 0 : index
    %c3_48 = arith.constant 3 : index
    %c0_49 = arith.constant 0 : index
    %c0_50 = arith.constant 0 : index
    %54 = vector.load %arg7[%c0_47, %c3_48, %c0_49, %c0_50] : memref<1x4x8x8xbf16, #tpu.memory_space<vmem>>, vector<1x1x8x8xbf16>
    %55 = vector.shape_cast %54 : vector<1x1x8x8xbf16> to vector<8x8xbf16>
    %56 = vector.shape_cast %53 : vector<8x8xbf16> to vector<1x1x8x8xbf16>
    tpu.vector_store %arg7[%c0_47, %c3_48, %c0_49, %c0_50], %56 {strides = array<i32>} : memref<1x4x8x8xbf16, #tpu.memory_space<vmem>>, vector<1x1x8x8xbf16>,
    return
  }
  func.func @transform_0(%arg0: i32, %arg1: i32) -> (i32, i32, i32) {
    %c0_i32 = arith.constant 0 : i32
    %c0_i32_0 = arith.constant 0 : i32
    return %arg0, %arg1, %c0_i32 : i32, i32, i32
  }
  func.func @transform_1(%arg0: i32, %arg1: i32) -> (i32, i32) {
    %c0_i32 = arith.constant 0 : i32
    %c0_i32_0 = arith.constant 0 : i32
    %c0_i32_1 = arith.constant 0 : i32
    return %c0_i32, %c0_i32_0 : i32, i32
  }
  func.func @transform_2(%arg0: i32, %arg1: i32) -> (i32, i32) {
    %c0_i32 = arith.constant 0 : i32
    %c0_i32_0 = arith.constant 0 : i32
    %c0_i32_1 = arith.constant 0 : i32
    return %c0_i32, %c0_i32_0 : i32, i32
  }
  func.func @transform_3(%arg0: i32, %arg1: i32) -> (i32, i32, i32, i32) {
    %c0_i32 = arith.constant 0 : i32
    %c0_i32_0 = arith.constant 0 : i32
    %c0_i32_1 = arith.constant 0 : i32
    return %arg0, %c0_i32, %arg1, %c0_i32_0 : i32, i32, i32, i32
  }
  func.func @transform_4(%arg0: i32, %arg1: i32) -> (i32, i32, i32, i32) {
    %c0_i32 = arith.constant 0 : i32
    %c0_i32_0 = arith.constant 0 : i32
    %c0_i32_1 = arith.constant 0 : i32
    return %arg0, %c0_i32, %arg1, %c0_i32_0 : i32, i32, i32, i32
  }
  func.func @transform_5(%arg0: i32, %arg1: i32) -> (i32, i32, i32, i32) {
    %c0_i32 = arith.constant 0 : i32
    %c0_i32_0 = arith.constant 0 : i32
    %c0_i32_1 = arith.constant 0 : i32
    return %arg0, %c0_i32, %arg1, %c0_i32_0 : i32, i32, i32, i32
  }
}

</mosaic_0001>

<bundles_post_ra>
// kernel: tpu_custom_call.1
= control target key start
LH: loop header
LB: loop body
LE: loop exit
PB: predicated region body
PF: predicated region fallthrough
CT: control target
= control target key end

     0   :  { %s1332_s0 = inlined_call_operand.hbm [shape: f32[2,8,32], index: 0, kind: input, shape index: {}]   ;;  %s1333_s1 = inlined_call_operand.hbm [shape: bf16[32,96], index: 1, kind: input, shape index: {}]   ;;  %s1334_s2 = inlined_call_operand.vmem [shape: f32[1,96], index: 2, kind: input, shape index: {}]   ;;  %s1335_s3 = inlined_call_operand.hbm [shape: bf16[2,4,8,8], index: 3, kind: output, shape index: {0}]   ;;  %s1336_s4 = inlined_call_operand.hbm [shape: bf16[2,4,8,8], index: 4, kind: output, shape index: {1}]   ;;  %s1337_s5 = inlined_call_operand.hbm [shape: bf16[2,4,8,8], index: 5, kind: output, shape index: {2}]  }
   0x1   :  { %1341 = sst [smem:[#allocation16_spill]] %s1333_s1 }
   0x2   :  { %11 = vsyncpa [#allocation3], 0 }
   0x3   :  { %13 = vsyncpa [#allocation3 + $0x1], 0 }
   0x4   :  { %14 = vsyncpa [#allocation6], 0 }
   0x5   :  { %15 = vsyncpa [#allocation4], 0 }
   0x6   :  { %17 = vsyncpa [#allocation4 + $0x1], 0 }
   0x7   :  { %18 = vsyncpa [#allocation9], 0 }
   0x8   :  { %20 = vsyncpa [#allocation9 + $0x1], 0  ;;  %s1042_s18 = smov 0   ;;  %s1044_s19 = smov 0  }
   0x9   :  { %s1046_s20 = smov 0   ;;  %s1048_s21 = smov 0  }
   0xa   :  { %s1050_s22 = smov 0   ;;  %s1052_s23 = smov 0  }
   0xb LB: > { %s1073_s24 = sadd.s32 4294967295, %s989_s23   ;;  %s1338_s25 = sadd.s32 4294967294, %s989_s23   ;;  %s989_s23 = sphi %s1052_s23, %s26_s23   ;;  %s985_s22 = sphi %s1050_s22, %s1362_s22   ;;  %s981_s21 = sphi %s1048_s21, %s1361_s21   ;;  %s977_s20 = sphi %s1046_s20, %s1360_s20   ;;  %s973_s19 = sphi %s1044_s19, %s1359_s19   ;;  %s969_s18 = sphi %s1042_s18, %s1358_s18  }
   0xc   : > { %p60_p0 = scmp.ne.s32.totalorder %s973_s19, %s969_s18  ;;  %p1340_p1 = scmp.eq.s32.totalorder %s1073_s24, 0 }
   0xd   : > { %p134_p3 = scmp.eq.s32.totalorder %s1338_s25, 1  ;;  %p643_p5 = scmp.ge.s32.totalorder %s989_s23, 1 }
   0xe   : > { %p1084_p4 = por %p1340_p1, %p60_p0  ;;  %p197_p7 = scmp.lt.s32.totalorder %s989_s23, 3 }
   0xf   : > { %p1089_p6 = por %p134_p3, %p60_p0  ;;  %s991_s29 = smov [#allocation5]  }
  0x10   : > { %p1094_p8 = pnand %p643_p5, %p197_p7  ;;  %s209_s30 = sshll.u32 %s991_s29, 4  ;;  %s210_s30 = int_to_ptr.vmem [resolvable:$true] %s209_s30 }
  0x11   : > { %s1343_s27 = scalar_select %p1089_p6, 1, 0 }
  0x12   : > { %p706_p9 = pneg %p1094_p8  ;;  %s38_s7 = sadd.s32 1, %s985_s22 }
  0x13   : > { %s806_s8 = scalar_lea.vmem %s210_s30, 256  ;;  %p814_p5 = scmp.lt.s32.totalorder %s210_s30, %s210_s30 }
  0x14   : > { %p1103_p11 = pnand %p706_p9, %p1340_p1  ;;  %p807_p13 = scmp.ne.s32.totalorder %s210_s30, %s806_s8 }
  0x15   : > { %p815_p7 = scmp.lt.s32.totalorder %s806_s8, %s806_s8 }
  0x16   : > { %p797_p12 = pneg %p1103_p11 }
  0x17   : > { %p816_p2 = por %p815_p7, %p814_p5 }
  0x18   : > { %p809_p0 = pnand %p807_p13, %p797_p12 }
  0x1a   : > { %p810_p3 = pneg %p809_p0 }
  0x1c   : > { %p817_p6 = pnand %p816_p2, %p810_p3 }
  0x1e   : > { %820 = shalt.err (!%p817_p6)
}
  0x1f   : > { %s992_s9 = smov 64   ;;  %s993_s10 = smov 4  }
  0x20   : > { %s1346_s1 = sld [smem:[#allocation16_spill]]  ;;  %p40_p2 = scmp.ge.s32.totalorder %s38_s7, 2 }
  0x21   : > { %s47_s13 = sadd.s32 1, %s977_s20  ;;  %p54_p6 = scmp.ne.s32.totalorder %s977_s20, %s973_s19 }
  0x22   : > { %p55_p9 = scmp.eq.s32.totalorder %s989_s23, 0  ;;  %s1364_s7 = smov (%p40_p2, %s38_s7), 0 }
  0x23   : > { %1347 = sst [smem:[#allocation15_spill]] %s1364_s7  ;;  %p1349_p13 = scmp.eq.s32.totalorder %s1073_s24, 1 }
  0x24   : > { %p1121_p12 = por %p55_p9, %p54_p6  ;;  %s42_s16 = ssub.s32 %s985_s22, %s1364_s7 }
  0x25   : > { %p1127_p0 = por %p1349_p13, %p54_p6  ;;  %p725_p3 = scmp.lt.s32.totalorder %s989_s23, 2 }
  0x26   : > { %709 = dma.hbm_to_vmem [thread:$0]  (!%p1103_p11), %s1346_s1, 256, %s210_s30, [#allocation6], %s992_s9, %s992_s9, %s993_s10  }
  0x27   : > { %p45_p11 = scmp.eq.s32.totalorder %s42_s16, 0  ;;  %s226_s17 = sand.u32 1, %s977_s20  }
  0x28   : > { %s646_s29 = sshll.u32 %s226_s17, 3  ;;  %s647_s6 = sshll.u32 %s985_s22, 7 }
  0x29   : > { %s1136_s30 = scalar_select %p45_p11, %s977_s20, %s47_s13  }
  0x2a   : > { %s236_s10 = scalar_lea.hbm %s1332_s0, %s647_s6  ;;  %s230_s11 = scalar_lea.vmem [#allocation2], %s646_s29 }
  0x2b   : > { %s238_s12 = sshll.u32 %s230_s11, 4  ;;  %p1144_p5 = pnand %p725_p3, %p1121_p12  ;;  %s239_s12 = int_to_ptr.vmem [resolvable:$true] %s238_s12 }
  0x2c   : > { %s227_s1 = scalar_lea.sflag [#allocation3], %s226_s17  ;;  %s834_s16 = scalar_lea.vmem %s239_s12, 128 }
  0x2d   : > { %p823_p7 = pneg %p1144_p5  ;;  %p835_p2 = scmp.ne.s32.totalorder %s239_s12, %s834_s16 }
  0x2e   : > { %s994_s13 = smov [#allocation2]  }
  0x2f   : > { %p837_p6 = pnand %p835_p2, %p823_p7  ;;  %s839_s7 = sshll.u32 %s994_s13, 4  ;;  %s840_s7 = int_to_ptr.vmem [resolvable:$false] %s839_s7 }
  0x30   : > { %s841_s6 = scalar_lea.vmem %s840_s7, 256  ;;  %p842_p13 = scmp.lt.s32.totalorder %s239_s12, %s840_s7 }
  0x31   : > { %p838_p9 = pneg %p837_p6  ;;  %p843_p11 = scmp.lt.s32.totalorder %s841_s6, %s834_s16 }
  0x33   : > { %p844_p10 = por %p843_p11, %p842_p13 }
  0x35   : > { %p845_p1 = pnand %p844_p10, %p838_p9 }
  0x37   : > { %848 = shalt.err (!%p845_p1)
}
  0x38   : > { %713 = dma.hbm_to_vmem [thread:$0]  (!%p1144_p5), %s236_s10, 128, %s239_s12, %s227_s1  }
  0x39   : > { %247 = sbr.rel (%p1094_p8) target bundleno = 450 (0x1c2), region = 32  ;;  %s1155_s14 = sand.u32 (!%p1094_p8), 1, %s973_s19  }
  0x3a   : > { %s649_s17 = sshll.u32 (!%p1094_p8), %s1155_s14, 3  ;;  %s250_s29 = scalar_lea.sflag (!%p1094_p8), [#allocation3], %s1155_s14 }
  0x3b   : > { %s253_s8 = scalar_lea.vmem (!%p1094_p8), [#allocation2], %s649_s17 }
  0x3e   : > { %952 = dma.done.wait (%p1084_p4), %s250_s29, 128  }
  0x3f   : > { %954 = vsyncadd (%p1084_p4), %s250_s29, 4294967168  ;;  %p1352_p1 = scmp.eq.s32.totalorder %s1073_s24, 0 }
  0x41   : > { %956 = dma.done.wait (%p1352_p1), [#allocation6], 256   ;;  %p1353_p10 = pmov %p1352_p1 }
  0x42   : > { %v995_v0 = vmov 0.0   ;;  %vm996_vm0 = vmmov 0   ;;  %v793_v1 = vld [vmem:[#allocation5 + $0x8] sm:$0xff]   ;;  %v794_v2 = vld [vmem:[#allocation5] sm:$0xff]   ;;  %v295_v3 = vld [vmem:[%s253_s8] sm:$0xff]  ;;  %vm320_vm1 = vcmask 261120  }
  0x43   : > { %958 = vsyncadd (%p1353_p10), [#allocation6], 4294967040  ;;  %686 = vmatprep.subr.bf16.mxu0 %v995_v0  ;;  %690 = vmatprep.mubr.msk.bf16.mxu0 %vm996_vm0, %v995_v0  ;;  %v296_v4 = vpack.c.bf16 %v295_v3, %v295_v3  ;;  %v654_v5 = vld [vmem:[%s1334_s2] ss:$0 sm:$0xff]  ;;  %s1171_s26 = sshll.u32 %s1155_s14, 4  ;;  %vm365_vm2 = vcmask 60416  }
  0x44   : > { %687 = vmatpush3.bf16.msra.mxu0 %v793_v1  ;;  %s997_s28 = smov 80   ;;  %s998_s7 = smov 96  }
  0x45   : > { %688 = vmatprep.subr.bf16.mxu0 %v995_v0  ;;  %s1174_s9 = scalar_lea.vmem [#allocation7], %s1171_s26  ;;  %s999_s10 = smov 72  }
  0x46   : > { %s1000_s11 = smov 88   ;;  %s1001_s12 = smov 120  }
  0x47   : > { %s1002_s16 = smov 64   ;;  %s1003_s13 = smov 112  }
  0x48   : > { %689 = vmatpush3.bf16.msra.mxu0 %v794_v2  ;;  %s1004_s6 = smov 56   ;;  %s1005_s17 = smov 104  }
  0x49   : > { %s1006_s29 = smov 48   ;;  %s1007_s8 = smov 40  }
  0x4a   : > { %s286_s1 = scalar_lea.vmem [#allocation8], %s1171_s26 }
  0x4b   : > { %691 = vmatmul.mubr.msk.bf16.vlgmr.msra.gmra.mxu0 %vm320_vm1, %v296_v4  ;;  %s465_s25 = sshll.u32 %s286_s1, 4  ;;  %s1186_s25 = int_to_ptr.vmem [resolvable:$true] %s465_s25 }
 0x10b   : > { %v358_v6 = vpop.f32.mrf.mxu0 }
 0x10c   : > { %v359_v7 = vadd.f32 %v654_v5, %v358_v6 }
 0x10d   : > { %v692_v8 = vpop.f32.mrf.mxu0 }
 0x10e   : > { %v364_v9 = vpack.c.bf16 %v359_v7, %v359_v7 }
 0x10f   : > { %v361_v10 = vpop.f32.mrf.mxu0 }
 0x110   : > { %398 = vrot.lane.b32.xlu1 %v364_v9, %s997_s28  ;;  %370 = vrot.lane.b32.xlu0 %v364_v9, %s998_s7  ;;  %366 = vst.msk [vmem:[%s1174_s9] sm:$0xf] %vm365_vm2, %v364_v9  ;;  %s428_s28 = sand.u32 1, %s1073_s24   ;;  %s1182_s7 = sshll.u32 %s981_s21, 8 }
 0x111   : > { %v693_v11 = vpop.f32.mrf.mxu0  ;;  %s1196_s21 = scalar_lea.sflag [#allocation9], %s428_s28  ;;  %s849_s24 = scalar_lea.vmem %s1186_s25, 256 }
 0x112   : > { %p850_p4 = scmp.ne.s32.totalorder %s1186_s25, %s849_s24 }
 0x114   : > { %413 = vrot.lane.b32.xlu1 %v364_v9, %s999_s10  ;;  %383 = vrot.lane.b32.xlu0 %v364_v9, %s1000_s11  ;;  %p851_p8 = pnand %p850_p4, %p1127_p0 }
 0x116   : > { %p852_p12 = pneg %p851_p8 }
 0x118   : > { %378 = vrot.lane.b32.xlu1 %v364_v9, %s1001_s12  ;;  %374 = vrot.lane.b32.xlu0 %v364_v9, %s1002_s16  ;;  %s1192_s12 = scalar_lea.hbm %s1336_s4, %s1182_s7 }
 0x11c   : > { %393 = vrot.lane.b32.xlu1 %v364_v9, %s1003_s13  ;;  %388 = vrot.lane.b32.xlu0 %v364_v9, %s1004_s6  ;;  %s1008_s13 = smov [#allocation8]  }
 0x11d   : > { %s853_s6 = sshll.u32 %s1008_s13, 4  ;;  %s854_s6 = int_to_ptr.vmem [resolvable:$false] %s853_s6 }
 0x11e   : > { %p856_p3 = scmp.lt.s32.totalorder %s1186_s25, %s854_s6 }
 0x120   : > { %408 = vrot.lane.b32.xlu1 %v364_v9, %s1005_s17  ;;  %403 = vrot.lane.b32.xlu0 %v364_v9, %s1006_s29  ;;  %s855_s17 = scalar_lea.vmem %s854_s6, 512 }
 0x121   : > { %p857_p5 = scmp.lt.s32.totalorder %s855_s17, %s849_s24 }
 0x123   : > { %p858_p7 = por %p857_p5, %p856_p3 }
 0x124   : > { %418 = vrot.lane.b32.xlu0 %v364_v9, %s1007_s8 }
 0x125   : > { %p859_p2 = pnand %p858_p7, %p852_p12 }
 0x182   : > { %v399_v12 = vpop.permute.xlu1 %398  ;;  %v371_v13 = vpop.permute.xlu0 %370 }
 0x183   : > { %663 = vst.msk [vmem:[%s286_s1 + $0x8] sm:$0xf] %vm365_vm2, %v399_v12  ;;  %373 = vst.msk [vmem:[%s286_s1] sm:$0xf] %vm365_vm2, %v371_v13 }
 0x186   : > { %v414_v14 = vpop.permute.xlu1 %413  ;;  %v384_v15 = vpop.permute.xlu0 %383 }
 0x187   : > { %666 = vst.msk [vmem:[%s286_s1 + $0xc] sm:$0xf] %vm365_vm2, %v414_v14  ;;  %660 = vst.msk [vmem:[%s286_s1 + $0x4] sm:$0xf] %vm365_vm2, %v384_v15 }
 0x188   : > { %862 = shalt.err (!%p859_p2)
}
 0x189   : > { %s863_s29 = scalar_lea.hbm %s1192_s12, 256  ;;  %s867_s28 = scalar_lea.hbm %s1336_s4, 512 }
 0x18a   : > { %p864_p6 = scmp.ne.s32.totalorder %s1192_s12, %s863_s29  ;;  %p868_p11 = scmp.lt.s32.totalorder %s1192_s12, %s1336_s4 }
 0x18b   : > { %p869_p1 = scmp.lt.s32.totalorder %s867_s28, %s863_s29 }
 0x18c   : > { %p865_p9 = pnand %p864_p6, %p1127_p0 }
 0x18d   : > { %p870_p10 = por %p869_p1, %p868_p11 }
 0x18e   : > { %p866_p13 = pneg %p865_p9 }
 0x190   : > { %p871_p4 = pnand %p870_p10, %p866_p13 }
 0x192   : > { %874 = shalt.err (!%p871_p4)
}
 0x193   : > { %s1009_s24 = smov 4   ;;  %v379_v16 = vpop.permute.xlu1 %378  ;;  %v375_v17 = vpop.permute.xlu0 %374  ;;  %s1225_s13 = scalar_lea.vmem [#allocation10], %s1171_s26 }
 0x194   : > { %701 = dma.vmem_to_hbm [thread:$0]  (%p1127_p0), %s1186_s25, 256, %s1192_s12, %s1196_s21, %s1002_s16, %s1002_s16, %s1009_s24  }
 0x195   : > { %659 = vst.msk [vmem:[%s1174_s9 + $0x4] sm:$0xf] %vm365_vm2, %v379_v16  ;;  %377 = vst.msk [vmem:[%s1225_s13] sm:$0xf] %vm365_vm2, %v375_v17  ;;  %s448_s6 = sshll.u32 %s1174_s9, 4  ;;  %s1240_s26 = scalar_lea.hbm %s1335_s3, %s1182_s7  ;;  %s1234_s6 = int_to_ptr.vmem [resolvable:$true] %s448_s6 }
 0x196   : > { %s482_s17 = sshll.u32 %s1225_s13, 4  ;;  %s424_s29 = scalar_lea.sflag [#allocation4], %s1155_s14  ;;  %s1273_s17 = int_to_ptr.vmem [resolvable:$true] %s482_s17 }
 0x197   : > { %v394_v18 = vpop.permute.xlu1 %393  ;;  %v389_v19 = vpop.permute.xlu0 %388  ;;  %s875_s8 = scalar_lea.vmem %s1234_s6, 256  ;;  %s1010_s1 = smov [#allocation7]  }
 0x198   : > { %662 = vst.msk [vmem:[%s1174_s9 + $0x8] sm:$0xf] %vm365_vm2, %v394_v18  ;;  %661 = vst.msk [vmem:[%s1225_s13 + $0x4] sm:$0xf] %vm365_vm2, %v389_v19  ;;  %p876_p8 = scmp.ne.s32.totalorder %s1234_s6, %s875_s8  ;;  %s879_s28 = sshll.u32 %s1010_s1, 4  ;;  %s880_s28 = int_to_ptr.vmem [resolvable:$false] %s879_s28 }
 0x199   : > { %s881_s10 = scalar_lea.vmem %s880_s28, 512  ;;  %p882_p5 = scmp.lt.s32.totalorder %s1234_s6, %s880_s28 }
 0x19a   : > { %p877_p12 = pnand %p876_p8, %p1127_p0  ;;  %p883_p7 = scmp.lt.s32.totalorder %s881_s10, %s875_s8 }
 0x19b   : > { %v409_v20 = vpop.permute.xlu1 %408  ;;  %v404_v21 = vpop.permute.xlu0 %403 }
 0x19c   : > { %665 = vst.msk [vmem:[%s1174_s9 + $0xc] sm:$0xf] %vm365_vm2, %v409_v20  ;;  %664 = vst.msk [vmem:[%s1225_s13 + $0x8] sm:$0xf] %vm365_vm2, %v404_v21  ;;  %p878_p3 = pneg %p877_p12  ;;  %p884_p2 = por %p883_p7, %p882_p5 }
 0x19e   : > { %p885_p6 = pnand %p884_p2, %p878_p3 }
 0x1a0   : > { %888 = shalt.err (!%p885_p6)
}
 0x1a1   : > { %s889_s9 = scalar_lea.hbm %s1240_s26, 256  ;;  %s893_s25 = scalar_lea.hbm %s1335_s3, 512 }
 0x1a2   : > { %p890_p9 = scmp.ne.s32.totalorder %s1240_s26, %s889_s9  ;;  %p894_p1 = scmp.lt.s32.totalorder %s1240_s26, %s1335_s3 }
 0x1a3   : > { %p895_p10 = scmp.lt.s32.totalorder %s893_s25, %s889_s9 }
 0x1a4   : > { %p891_p13 = pnand %p890_p9, %p1127_p0 }
 0x1a5   : > { %p896_p4 = por %p895_p10, %p894_p1 }
 0x1a6   : > { %p892_p11 = pneg %p891_p13 }
 0x1a8   : > { %p897_p8 = pnand %p896_p4, %p892_p11 }
 0x1aa   : > { %900 = shalt.err (!%p897_p8)
}
 0x1ab   : > { %700 = dma.vmem_to_hbm [thread:$0]  (%p1127_p0), %s1234_s6, 256, %s1240_s26, %s424_s29, %s1002_s16, %s1002_s16, %s1009_s24   ;;  %v419_v22 = vpop.permute.xlu0 %418 }
 0x1ac   : > { %s1279_s10 = scalar_lea.hbm %s1337_s5, %s1182_s7  ;;  %667 = vst.msk [vmem:[%s1225_s13 + $0xc] sm:$0xf] %vm365_vm2, %v419_v22  ;;  %s901_s9 = scalar_lea.vmem %s1273_s17, 256 }
 0x1ad   : > { %p902_p12 = scmp.ne.s32.totalorder %s1273_s17, %s901_s9  ;;  %s1011_s6 = smov [#allocation10]  }
 0x1ae   : > { %s905_s26 = sshll.u32 %s1011_s6, 4  ;;  %s906_s26 = int_to_ptr.vmem [resolvable:$false] %s905_s26 }
 0x1af   : > { %p903_p3 = pnand %p902_p12, %p1127_p0  ;;  %s907_s29 = scalar_lea.vmem %s906_s26, 512 }
 0x1b0   : > { %p908_p7 = scmp.lt.s32.totalorder %s1273_s17, %s906_s26  ;;  %p909_p2 = scmp.lt.s32.totalorder %s907_s29, %s901_s9 }
 0x1b1   : > { %p904_p5 = pneg %p903_p3 }
 0x1b2   : > { %p910_p6 = por %p909_p2, %p908_p7 }
 0x1b4   : > { %p911_p9 = pnand %p910_p6, %p904_p5 }
 0x1b6   : > { %914 = shalt.err (!%p911_p9)
}
 0x1b7   : > { %s915_s7 = scalar_lea.hbm %s1279_s10, 256  ;;  %s919_s11 = scalar_lea.hbm %s1337_s5, 512 }
 0x1b8   : > { %p916_p13 = scmp.ne.s32.totalorder %s1279_s10, %s915_s7  ;;  %p920_p10 = scmp.lt.s32.totalorder %s1279_s10, %s1337_s5 }
 0x1b9   : > { %p921_p4 = scmp.lt.s32.totalorder %s919_s11, %s915_s7 }
 0x1ba   : > { %p917_p11 = pnand %p916_p13, %p1127_p0 }
 0x1bb   : > { %p922_p8 = por %p921_p4, %p920_p10 }
 0x1bc   : > { %p918_p1 = pneg %p917_p11 }
 0x1be   : > { %p923_p12 = pnand %p922_p8, %p918_p1 }
 0x1c0   : > { %926 = shalt.err (!%p923_p12)
}
 0x1c1   : > { %702 = dma.vmem_to_hbm [thread:$0]  (%p1127_p0), %s1273_s17, 256, %s1279_s10, %s1196_s21, %s1002_s16, %s1002_s16, %s1009_s24  }
 0x1c2 PF: > { %s497_s1 = sand.u32 1, %s969_s18   ;;  %p1354_p3 = scmp.ne.s32.totalorder %s1343_s27, 0 }
 0x1c3   : > { %p1355_p5 = scmp.ge.s32.totalorder %s989_s23, 2  ;;  %s498_s8 = scalar_lea.sflag [#allocation4], %s497_s1 }
 0x1c5   : > { %p715_p7 = pnand %p1355_p5, %p1354_p3 }
 0x1c7   : > { %p716_p2 = pneg %p715_p7 }
 0x1c9   : > { %960 = dma.done.wait (%p716_p2), %s498_s8, 256  }
 0x1ca   : > { %962 = vsyncadd (%p716_p2), %s498_s8, 4294967040  ;;  %s1356_s15 = sadd.s32 4294967294, %s989_s23  }
 0x1cb   : > { %s506_s28 = sand.u32 1, %s1356_s15  }
 0x1cc   : > { %s507_s9 = scalar_lea.sflag [#allocation9], %s506_s28 }
 0x1cd   : > { %964 = dma.done.wait (%p716_p2), %s507_s9, 512  }
 0x1ce   : > { %966 = vsyncadd (%p716_p2), %s507_s9, 4294966784  ;;  %s26_s23 = sadd.s32 1, %s989_s23   ;;  %s1357_s27 = sld [smem:[#allocation15_spill]] }
 0x1cf   : > { %p23_p0 = scmp.ge.s32.totalorder %s26_s23, 4   ;;  %s1358_s18 = smov %s973_s19 }
 0x1d0   : > { %s1359_s19 = smov %s977_s20  ;;  %s1360_s20 = smov %s1136_s30 }
 0x1d1   : > { %s1361_s21 = smov %s985_s22  ;;  %25 = sbr.rel (!%p23_p0) target bundleno = 11 (0xb), region = 122 }
 0x1d4   : > { %s1362_s22 = smov %s1357_s27 }
 0x1d6   :  { %521 = vsyncpa [#allocation3], 1 }
 0x1d7   :  { %523 = vsyncpa [#allocation3 + $0x1], 1 }
 0x1d8   :  { %524 = vsyncpa [#allocation6], 1 }
 0x1d9   :  { %525 = vsyncpa [#allocation4], 1 }
 0x1da   :  { %527 = vsyncpa [#allocation4 + $0x1], 1 }
 0x1db   :  { %528 = vsyncpa [#allocation9], 1 }
 0x1dc   :  { %530 = vsyncpa [#allocation9 + $0x1], 1 }

</bundles_post_ra>
